<compile_context>
chip_gen: v6e
topology: v6e:2x2x1
jax: 0.10.0
libtpu: 0.0.40
codegen_flags: <defaults>
</compile_context>

<pallas_src>
import functools

import jax
import jax.numpy as jnp
from jax import lax
from jax.experimental import pallas as pl
from jax.experimental.pallas import tpu as pltpu


def _ssm_block_kernel(x_ref, w_ref, b_ref, out_ref, *, d_pad):
    # x_ref   : (T, Din)    f32  one batch element's token features
    # w_ref   : (Din, Dp)   bf16 projection weight (resident across grid steps)
    # b_ref   : (1, Dp)     f32  projection bias
    # out_ref : (T, 2*Dp)   f32  fused [proj | history] for this batch element
    x = x_ref[...].astype(jnp.bfloat16)          # in-kernel cast (VPU)
    w = w_ref[...]
    bias = b_ref[...]

    # MXU matmul with f32 accumulation; bias add in f32.
    proj = jnp.dot(x, w, preferred_element_type=jnp.float32) + bias    # (T, Dp)

    # history[t] = proj[t-1], history[0] = 0.  The whole T axis lives in this
    # block, so the sublane roll is local to the batch element and only row 0
    # (which wraps to row T-1) needs masking -- a single column compare.
    rolled = pltpu.roll(proj, shift=1, axis=0)                         # XLU
    row0 = lax.broadcasted_iota(jnp.int32, (proj.shape[0], 1), 0) == 0
    hist = jnp.where(row0, 0.0, rolled)                                # (T, Dp)

    # Fused, lane-aligned stores: [proj | history] along the feature axis.
    out_ref[:, :d_pad] = proj
    out_ref[:, d_pad:] = hist


@jax.jit
def ssm_block_forward(x, w, b):
    """x: (B, T, Din) f32; w: (Din, D) f32; b: (1, D) f32 -> (B, T, 2*D) f32."""
    B, T, Din = x.shape
    D = w.shape[1]
    Dp = ((D + 127) // 128) * 128     # lane-dense feature width (== D for real
                                      # encoder widths 512 / 768)

    # Weight/bias layout plumbing (tiny, done once): bf16 weight for the MXU,
    # feature dim zero-padded to a 128-lane multiple.
    w_p = jnp.pad(w.astype(jnp.bfloat16), ((0, 0), (0, Dp - D)))
    b_p = jnp.pad(b.astype(jnp.float32), ((0, 0), (0, Dp - D)))

    # Grid over batch elements; each step processes one (T, Din) slab and
    # emits one fused (T, 2*Dp) slab.  Weight/bias index_maps are constant so
    # they are DMA'd once and stay resident.
    # TODO(synk): for very small T with very large B, group several batch
    # elements per block (roll along axis=1) to reach the ~512-row tiles that
    # saturate the HBM roofline; per-generation VMEM sizing would then matter
    # (v7x: 64 MiB physical / 32 MiB default scoped limit).
    out_p = pl.pallas_call(
        functools.partial(_ssm_block_kernel, d_pad=Dp),
        grid=(B,),
        in_specs=[
            pl.BlockSpec((None, T, Din), lambda bi: (bi, 0, 0)),   # x: one batch element
            pl.BlockSpec((Din, Dp), lambda bi: (0, 0)),            # W: resident
            pl.BlockSpec((1, Dp), lambda bi: (0, 0)),              # bias: resident
        ],
        out_specs=pl.BlockSpec((None, T, 2 * Dp), lambda bi: (bi, 0, 0)),
        out_shape=jax.ShapeDtypeStruct((B, T, 2 * Dp), jnp.float32),
        compiler_params=pltpu.CompilerParams(
            dimension_semantics=("parallel",),
        ),
    )(x, w_p, b_p)

    if Dp == D:
        # Already the fused [proj | history] layout -- nothing to do.
        return out_p
    # Padded-width path (toy D not a multiple of 128): slice the two halves.
    return jnp.concatenate([out_p[..., :D], out_p[..., Dp:Dp + D]], axis=2)


def reference_forward(x, w, b):
    """Pure-f32 JAX reference mirroring the PyTorch semantics."""
    proj = jnp.einsum("btd,de->bte", x, w) + b[None]
    history = jnp.concatenate(
        [jnp.zeros_like(proj[:, :1, :]), proj[:, :-1, :]], axis=1
    )
    return jnp.concatenate([proj, history], axis=2)


def reference_forward_bf16(x, w, b):
    """Reference using the same bf16-in / f32-accumulate matmul as the kernel."""
    proj = jnp.einsum(
        "btd,de->bte",
        x.astype(jnp.bfloat16),
        w.astype(jnp.bfloat16),
        preferred_element_type=jnp.float32,
    ) + b[None]
    history = jnp.concatenate(
        [jnp.zeros_like(proj[:, :1, :]), proj[:, :-1, :]], axis=1
    )
    return jnp.concatenate([proj, history], axis=2)


if __name__ == "__main__":
    # config['input_dim'] = 32, config['num_frames'] = 32 -> T = 32 // 4 = 8, B = 2.
    B, T, Din, D = 2, 8, 32, 32

    key = jax.random.PRNGKey(0)
    k_x, k_w = jax.random.split(key)

    # Token features (stand-in for tokenized/embedded text input).
    x = jax.random.normal(k_x, (B, T, Din), dtype=jnp.float32)

    # Deterministic Xavier-uniform init for the projection weight, zero bias.
    limit = (6.0 / (Din + D)) ** 0.5
    w = jax.random.uniform(k_w, (Din, D), dtype=jnp.float32,
                           minval=-limit, maxval=limit)
    b = jnp.zeros((1, D), dtype=jnp.float32)

    out = ssm_block_forward(x, w, b)
    jax.block_until_ready(out)

    assert out.shape == (B, T, 2 * D), out.shape

    # Tight check vs. a reference with identical bf16 matmul inputs.
    ref_bf16 = reference_forward_bf16(x, w, b)
    assert jnp.allclose(out, ref_bf16, atol=1e-3, rtol=1e-3), "mismatch vs bf16 ref"

    # Loose check vs. the full-f32 PyTorch-semantics reference.
    ref_f32 = reference_forward(x, w, b)
    assert jnp.allclose(out, ref_f32, atol=5e-2, rtol=5e-2), "mismatch vs f32 ref"

    print("KERNEL_OK")
</pallas_src>

<mosaic_0001>
module attributes {stable_mosaic.version = 11 : i64} {
  func.func @_ssm_block_kernel(%arg0: i32, %arg1: memref<1x8x32xf32, #tpu.memory_space<vmem>>, %arg2: memref<32x128xbf16, #tpu.memory_space<vmem>>, %arg3: memref<1x128xf32, #tpu.memory_space<vmem>>, %arg4: memref<1x8x256xf32, #tpu.memory_space<vmem>>) attributes {dimension_semantics = [#tpu.dimension_semantics<parallel>], iteration_bounds = array<i64: 2>, scalar_prefetch = 0 : i64, scratch_operands = 0 : i64, tpu.core_type = #tpu.core_type<tc>, window_params = [{transform_indices = @transform_0, window_bounds = array<i64: 1, 8, 32>}, {pipeline_mode = #tpu.pipeline_mode<synchronous>, transform_indices = @transform_1, window_bounds = array<i64: 32, 128>}, {pipeline_mode = #tpu.pipeline_mode<synchronous>, transform_indices = @transform_2, window_bounds = array<i64: 1, 128>}, {transform_indices = @transform_3, window_bounds = array<i64: 1, 8, 256>}]} {
    %c0 = arith.constant 0 : index
    %c0_0 = arith.constant 0 : index
    %c0_1 = arith.constant 0 : index
    %0 = vector.load %arg1[%c0, %c0_0, %c0_1] : memref<1x8x32xf32, #tpu.memory_space<vmem>>, vector<1x8x32xf32>
    %1 = vector.shape_cast %0 : vector<1x8x32xf32> to vector<8x32xf32>
    %2 = arith.truncf %1 : vector<8x32xf32> to vector<8x32xbf16>
    %c0_2 = arith.constant 0 : index
    %c0_3 = arith.constant 0 : index
    %3 = vector.load %arg2[%c0_2, %c0_3] : memref<32x128xbf16, #tpu.memory_space<vmem>>, vector<32x128xbf16>
    %c0_4 = arith.constant 0 : index
    %c0_5 = arith.constant 0 : index
    %4 = vector.load %arg3[%c0_4, %c0_5] : memref<1x128xf32, #tpu.memory_space<vmem>>, vector<1x128xf32>
    %cst = arith.constant dense<0.000000e+00> : vector<8x128xf32>
    %5 = tpu.matmul %2, %3, %cst {dimension_numbers = #tpu.dot_dimension_numbers<[1], [0], [0], [1], [0, 0, 1, 1], [], []>} : vector<8x32xbf16>, vector<32x128xbf16>, vector<8x128xf32> -> vector<8x128xf32>
    %6 = vector.broadcast %4 : vector<1x128xf32> to vector<8x128xf32>
    %7 = arith.addf %5, %6 : vector<8x128xf32>
    %c1_i32 = arith.constant 1 : i32
    %8 = tpu.dynamic_rotate %7 by %c1_i32 dim 0 : vector<8x128xf32>, i32 -> vector<8x128xf32>
    %9 = tpu.iota {dimensions = array<i32: 0>} : vector<8x1xi32>
    %c0_i32 = arith.constant 0 : i32
    %10 = vector.broadcast %c0_i32 : i32 to vector<8x1xi32>
    %11 = arith.cmpi eq, %9, %10 : vector<8x1xi32>
    %cst_6 = arith.constant 0.000000e+00 : f32
    %12 = vector.shape_cast %11 : vector<8x1xi1> to vector<8x1xi1>
    %13 = vector.broadcast %12 : vector<8x1xi1> to vector<8x128xi1>
    %14 = vector.broadcast %cst_6 : f32 to vector<8x128xf32>
    %15 = arith.select %13, %14, %8 : vector<8x128xi1>, vector<8x128xf32>
    %c0_7 = arith.constant 0 : index
    %c0_8 = arith.constant 0 : index
    %c0_9 = arith.constant 0 : index
    %16 = vector.load %arg4[%c0_7, %c0_8, %c0_9] : memref<1x8x256xf32, #tpu.memory_space<vmem>>, vector<1x8x128xf32>
    %17 = vector.shape_cast %16 : vector<1x8x128xf32> to vector<8x128xf32>
    %18 = vector.shape_cast %7 : vector<8x128xf32> to vector<1x8x128xf32>
    tpu.vector_store %arg4[%c0_7, %c0_8, %c0_9], %18 {strides = array<i32>} : memref<1x8x256xf32, #tpu.memory_space<vmem>>, vector<1x8x128xf32>,
    %c0_10 = arith.constant 0 : index
    %c0_11 = arith.constant 0 : index
    %c128 = arith.constant 128 : index
    %19 = vector.load %arg4[%c0_10, %c0_11, %c128] : memref<1x8x256xf32, #tpu.memory_space<vmem>>, vector<1x8x128xf32>
    %20 = vector.shape_cast %19 : vector<1x8x128xf32> to vector<8x128xf32>
    %21 = vector.shape_cast %15 : vector<8x128xf32> to vector<1x8x128xf32>
    tpu.vector_store %arg4[%c0_10, %c0_11, %c128], %21 {strides = array<i32>} : memref<1x8x256xf32, #tpu.memory_space<vmem>>, vector<1x8x128xf32>,
    return
  }
  func.func @transform_0(%arg0: i32) -> (i32, i32, i32) {
    %c0_i32 = arith.constant 0 : i32
    %c0_i32_0 = arith.constant 0 : i32
    %c0_i32_1 = arith.constant 0 : i32
    return %arg0, %c0_i32, %c0_i32_0 : i32, i32, i32
  }
  func.func @transform_1(%arg0: i32) -> (i32, i32) {
    %c0_i32 = arith.constant 0 : i32
    %c0_i32_0 = arith.constant 0 : i32
    %c0_i32_1 = arith.constant 0 : i32
    return %c0_i32, %c0_i32_0 : i32, i32
  }
  func.func @transform_2(%arg0: i32) -> (i32, i32) {
    %c0_i32 = arith.constant 0 : i32
    %c0_i32_0 = arith.constant 0 : i32
    %c0_i32_1 = arith.constant 0 : i32
    return %c0_i32, %c0_i32_0 : i32, i32
  }
  func.func @transform_3(%arg0: i32) -> (i32, i32, i32) {
    %c0_i32 = arith.constant 0 : i32
    %c0_i32_0 = arith.constant 0 : i32
    %c0_i32_1 = arith.constant 0 : i32
    return %arg0, %c0_i32, %c0_i32_0 : i32, i32, i32
  }
}

</mosaic_0001>

<bundles_post_ra>
// kernel: ssm_block_forward.1
= control target key start
LH: loop header
LB: loop body
LE: loop exit
PB: predicated region body
PF: predicated region fallthrough
CT: control target
= control target key end

     0   :  { %s370_s12 = smov 0   ;;  %s396_s0 = inlined_call_operand.vmem [shape: f32[2,8,32], index: 0, kind: input, shape index: {}]   ;;  %s397_s1 = inlined_call_operand.vmem [shape: bf16[32,128], index: 1, kind: input, shape index: {}]   ;;  %s398_s2 = inlined_call_operand.vmem [shape: f32[1,128], index: 2, kind: input, shape index: {}]   ;;  %s399_s3 = inlined_call_operand.vmem [shape: f32[2,8,256], index: 3, kind: output, shape index: {}]  }
   0x1 LB: > { %s302_s13 = sadd.s32 4294967295, %s346_s12   ;;  %p306_p0 = scmp.ge.s32.totalorder %s346_s12, 1  ;;  %s346_s12 = sphi %s370_s12, %s13_s12  }
   0x2   : > { %p136_p1 = scmp.lt.s32.totalorder %s346_s12, 3 }
   0x4   : > { %p137_p2 = pnand %p306_p0, %p136_p1 }
   0x5   : > { %p159_p3 = scmp.lt.s32.totalorder (!%p137_p2), %s302_s13, 1 }
   0x6   : > { %140 = sbr.rel (%p137_p2) target bundleno = 219 (0xdb), region = 32 }
   0xb   : > { %v338_v0 = vld [vmem:[%s397_s1 + $0x8] sm:$0xff]   ;;  %v348_v1 = vmov 0.0   ;;  %v339_v2 = vld [vmem:[%s397_s1] sm:$0xff]   ;;  %vm349_vm0 = vmmov 0   ;;  %s401_s13 = smov (!%p159_p3, %s302_s13), 1  ;;  %vm194_vm1 = vcmask 261120   ;;  %v239_v5 = vlaneseq }
   0xc   : > { %320 = vmatprep.subr.bf16.mxu0 %v348_v1  ;;  %324 = vmatprep.mubr.msk.bf16.mxu0 %vm349_vm0, %v348_v1  ;;  %s307_s18 = sshll.u32 %s401_s13, 3  ;;  %s316_s22 = sshll.u32 %s401_s13, 4  ;;  %v310_v6 = vld [vmem:[%s398_s2] ss:$0 sm:$0xff] }
   0xd   : > { %321 = vmatpush3.bf16.msra.mxu0 %v338_v0  ;;  %s162_s21 = scalar_lea.vmem %s396_s0, %s307_s18  ;;  %v240_v7 = vshrl.u32 %v239_v5, 7  ;;  %s167_s27 = scalar_lea.vmem %s399_s3, %s316_s22 }
   0xe   : > { %322 = vmatprep.subr.bf16.mxu0 %v348_v1  ;;  %v169_v3 = vld [vmem:[%s162_s21] sm:$0xff] }
   0xf   : > { %v170_v4 = vpack.c.bf16 %v169_v3, %v169_v3  ;;  %vm241_vm2 = vcmp.eq.s32.totalorder %v240_v7, 0 }
  0x11   : > { %323 = vmatpush3.bf16.msra.mxu0 %v339_v2 }
  0x14   : > { %325 = vmatmul.mubr.msk.bf16.vlgmr.msra.gmra.mxu0 %vm194_vm1, %v170_v4 }
  0xd4   : > { %v232_v8 = vpop.f32.mrf.mxu0 }
  0xd5   : > { %v233_v9 = vadd.f32 %v310_v6, %v232_v8 }
  0xd6   : > { %v326_v10 = vpop.f32.mrf.mxu0 }
  0xd7   : > { %v238_v11 = vrot.slane %v233_v9, 7  ;;  %245 = vst [vmem:[%s167_s27] sm:$0xff] %v233_v9 }
  0xd8   : > { %v235_v12 = vpop.f32.mrf.mxu0 }
  0xd9   : > { %v244_v13 = vsel %vm241_vm2, 0.0, %v238_v11 }
  0xda   : > { %246 = vst [vmem:[%s167_s27 + $0x8] sm:$0xff] %v244_v13  ;;  %v327_v14 = vpop.f32.mrf.mxu0 }
  0xdb PF: > { %s13_s12 = sadd.s32 1, %s346_s12  }
  0xdc   : > { %p10_p4 = scmp.ge.s32.totalorder %s13_s12, 4  }
  0xde   :  { %12 = sbr.rel (!%p10_p4) target bundleno = 1 (0x1), region = 62 }

</bundles_post_ra>
